<compile_context>
chip_gen: v7x
topology: tpu7x:2x2x1
jax: 0.10.0
libtpu: 0.0.40
codegen_flags: <defaults>
</compile_context>

<pallas_src>
import functools

import jax
import jax.numpy as jnp
from jax.experimental import pallas as pl
from jax.experimental.pallas import tpu as pltpu

LANES = 128
# Target ~1 MiB (f32) tiles: 256 * 1024 elements.
_TARGET_TILE_ELEMS = 256 * 1024
# Candidate lane-dense widths for the 2-D view (largest first).
_COL_CANDIDATES = (4096, 2048, 1024, 512, 256, 128)


def _u1tanh_kernel(x_ref, o_ref, *, scale):
    # (tanh(s*x) + 1) / 2  ==  sigmoid(2*s*x): single EUP op + one VPU mul.
    o_ref[...] = jax.nn.sigmoid(scale * x_ref[...])


def u1tanh(x, sloop=1.0):
    """Elementwise (tanh(sloop*x)+1)/2 computed in a Pallas TPU kernel."""
    orig_shape = x.shape
    orig_dtype = x.dtype
    scale = float(2.0 * sloop)  # folded at trace time

    flat = x.reshape(-1)
    n = flat.shape[0]

    # ---- choose a lane-dense 2-D view (rows, cols) --------------------------
    # Prefer a `cols` that divides n exactly so the aligned (common) case needs
    # no padding and no final slice.
    cols = None
    for c in _COL_CANDIDATES:
        if n >= c and n % c == 0:
            cols = c
            break

    padded = n
    if cols is None:
        # Ragged element count (not a multiple of 128): pad the tail.  This
        # costs one extra HBM round-trip (jnp.pad materializes a copy) but only
        # triggers in the ragged case.
        cols = 1024 if n >= 1024 else LANES
        padded = pl.cdiv(n, cols) * cols
        flat = jnp.pad(flat, (0, padded - n))

    rows = padded // cols
    x2d = flat.reshape(rows, cols)

    # ---- choose the block's sublane extent (~1 MiB f32 per tile) ------------
    max_rows = max(8, _TARGET_TILE_ELEMS // cols)
    if rows <= max_rows:
        block_rows = rows                        # full extent: always legal
    else:
        block_rows = max_rows - (max_rows % 8)   # multiple of 8 sublanes
    grid = (pl.cdiv(rows, block_rows),)          # boundary block is masked

    out2d = pl.pallas_call(
        functools.partial(_u1tanh_kernel, scale=scale),
        out_shape=jax.ShapeDtypeStruct((rows, cols), orig_dtype),
        grid_spec=pltpu.PrefetchScalarGridSpec(
            num_scalar_prefetch=0,
            grid=grid,
            in_specs=[pl.BlockSpec((block_rows, cols), lambda i: (i, 0))],
            out_specs=pl.BlockSpec((block_rows, cols), lambda i: (i, 0)),
        ),
        compiler_params=pltpu.CompilerParams(
            # Single grid axis, parallel -> shards across both TCs on v7x.
            dimension_semantics=("parallel",),
        ),
    )(x2d)

    if padded == n:
        # Pure metadata reshape: no extra HBM traffic.
        return out2d.reshape(orig_shape)
    return out2d.reshape(-1)[:n].reshape(orig_shape)


def _reference(x, sloop=1.0):
    return (jnp.tanh(sloop * x) + 1.0) / 2.0


if __name__ == "__main__":
    key = jax.random.PRNGKey(0)

    test_shapes = [
        (2, 4, 16, 16),     # module-typical NCHW input (aligned fast path)
        (1, 8, 64, 64),     # larger aligned input -> multi-step grid
        (3, 5, 7, 11),      # ragged element count -> padded tail path
    ]

    ok = True
    for shape in test_shapes:
        key, sub = jax.random.split(key)
        x = jax.random.normal(sub, shape, dtype=jnp.float32)

        y = u1tanh(x, sloop=1.0)
        y = jax.block_until_ready(y)

        y_ref = _reference(x, sloop=1.0)
        assert y.shape == x.shape and y.dtype == x.dtype
        if not jnp.allclose(y, y_ref, atol=1e-5, rtol=1e-5):
            ok = False
            print("mismatch at", shape,
                  "max_abs_err=", float(jnp.max(jnp.abs(y - y_ref))))

    assert ok
    print("KERNEL_OK")
</pallas_src>

<mosaic_0001>
module attributes {stable_mosaic.version = 11 : i64} {
  func.func @_u1tanh_kernel(%arg0: i32, %arg1: memref<1x2048xf32, #tpu.memory_space<vmem>>, %arg2: memref<1x2048xf32, #tpu.memory_space<vmem>>) attributes {dimension_semantics = [#tpu.dimension_semantics<parallel>], iteration_bounds = array<i64: 1>, scalar_prefetch = 0 : i64, scratch_operands = 0 : i64, tpu.core_type = #tpu.core_type<tc>, window_params = [{transform_indices = @transform_0, window_bounds = array<i64: 1, 2048>}, {transform_indices = @transform_1, window_bounds = array<i64: 1, 2048>}]} {
    %c0 = arith.constant 0 : index
    %c0_0 = arith.constant 0 : index
    %0 = vector.load %arg1[%c0, %c0_0] : memref<1x2048xf32, #tpu.memory_space<vmem>>, vector<1x2048xf32>
    %cst = arith.constant 2.000000e+00 : f32
    %1 = vector.broadcast %cst : f32 to vector<1x2048xf32>
    %2 = arith.mulf %1, %0 : vector<1x2048xf32>
    %3 = arith.negf %2 : vector<1x2048xf32>
    %4 = math.exp %3 : vector<1x2048xf32>
    %cst_1 = arith.constant 1.000000e+00 : f32
    %5 = vector.broadcast %cst_1 : f32 to vector<1x2048xf32>
    %6 = arith.addf %5, %4 : vector<1x2048xf32>
    %7 = arith.divf %5, %6 : vector<1x2048xf32>
    %c0_2 = arith.constant 0 : index
    %c0_3 = arith.constant 0 : index
    %8 = vector.load %arg2[%c0_2, %c0_3] : memref<1x2048xf32, #tpu.memory_space<vmem>>, vector<1x2048xf32>
    tpu.vector_store %arg2[%c0_2, %c0_3], %7 {strides = array<i32>} : memref<1x2048xf32, #tpu.memory_space<vmem>>, vector<1x2048xf32>,
    return
  }
  func.func @transform_0(%arg0: i32) -> (i32, i32) {
    %c0_i32 = arith.constant 0 : i32
    %c0_i32_0 = arith.constant 0 : i32
    return %arg0, %c0_i32 : i32, i32
  }
  func.func @transform_1(%arg0: i32) -> (i32, i32) {
    %c0_i32 = arith.constant 0 : i32
    %c0_i32_0 = arith.constant 0 : i32
    return %arg0, %c0_i32 : i32, i32
  }
}

</mosaic_0001>

<bundles_post_ra>
// kernel: tpu_custom_call.1
= control target key start
LH: loop header
LB: loop body
LE: loop exit
PB: predicated region body
PF: predicated region fallthrough
CT: control target
= control target key end

     0   :  { %6 = vsyncpa [#allocation3], 0  ;;  %s150_s0 = inlined_call_operand.hbm [shape: f32[1,2048], index: 0, kind: input, shape index: {}]   ;;  %s151_s1 = inlined_call_operand.hbm [shape: f32[1,2048], index: 1, kind: output, shape index: {}]  }
   0x1   :  { %7 = vsyncpa [#allocation4], 0  ;;  %s114_s6 = smov [#allocation2]   ;;  %s66_s10 = scalar_lea.hbm %s150_s0, 256 }
   0x2   :  { %s14_s7 = sshll.u32 %s114_s6, 4  ;;  %p67_p0 = scmp.ne.s32.totalorder %s150_s0, %s66_s10  ;;  %s15_s7 = int_to_ptr.vmem [resolvable:$true] %s14_s7 }
   0x3   :  { %p70_p1 = scmp.lt.u32.totalorder %s66_s10, %s150_s0 }
   0x5   :  { %p72_p2 = pnand %p70_p1, %p67_p0 }
   0x7   :  { %75 = shalt.err (!%p72_p2)
}
   0x8   :  { %s76_s15 = scalar_lea.vmem %s15_s7, 256  ;;  %p81_p4 = scmp.lt.s32.totalorder %s15_s7, %s15_s7 }
   0x9   :  { %p77_p3 = scmp.ne.s32.totalorder %s15_s7, %s76_s15  ;;  %p82_p5 = scmp.lt.s32.totalorder %s76_s15, %s76_s15 }
   0xb   :  { %p83_p6 = por %p82_p5, %p81_p4 }
   0xd   :  { %p84_p7 = pnand %p83_p6, %p77_p3 }
   0xf   :  { %87 = shalt.err (!%p84_p7)
}
  0x10   :  { %17 = dma.hbm_to_vmem [thread:$0]  %s150_s0, 256, %s15_s7, [#allocation3]  }
  0x11   :  { %110 = dma.done.wait [#allocation3], 256  }
  0x12   :  { %111 = vsyncadd [#allocation3], 4294967040  ;;  %v21_v0 = vld [vmem:[#allocation2] sm:$0xff]  ;;  %v22_v1 = vld [vmem:[#allocation2 + $0x8] sm:$0xff]  ;;  %s115_s18 = smov [#allocation5]  }
  0x13   :  { %v54_v2 = vmul.f32 -2.0, %v21_v0  ;;  %v55_v3 = vmul.f32 -2.0, %v22_v1  ;;  %s45_s19 = sshll.u32 %s115_s18, 4  ;;  %s46_s19 = int_to_ptr.vmem [resolvable:$true] %s45_s19 }
  0x14   :  { %s88_s0 = scalar_lea.vmem %s46_s19, 256  ;;  %p93_p9 = scmp.lt.s32.totalorder %s46_s19, %s46_s19 }
  0x15   :  { %v27_v4 = vmul.f32 1.442695, %v54_v2  ;;  %v29_v5 = vmul.f32 1.442695, %v55_v3  ;;  %p89_p8 = scmp.ne.s32.totalorder %s46_s19, %s88_s0  ;;  %p94_p10 = scmp.lt.s32.totalorder %s88_s0, %s88_s0 }
  0x17   :  { %58 = vpow2.f32 %v27_v4  ;;  %p95_p11 = por %p94_p10, %p93_p9 }
  0x18   :  { %60 = vpow2.f32 %v29_v5 }
  0x19   :  { %p96_p12 = pnand %p95_p11, %p89_p8 }
  0x21   :  { %v59_v6 = vpop.eup %58 }
  0x22   :  { %v61_v7 = vpop.eup %60  ;;  %v31_v8 = vadd.f32 1.0, %v59_v6 }
  0x23   :  { %v32_v9 = vadd.f32 1.0, %v61_v7 }
  0x24   :  { %62 = vrcp.f32 %v31_v8 }
  0x25   :  { %64 = vrcp.f32 %v32_v9 }
  0x2e   :  { %v63_v10 = vpop.eup %62 }
  0x2f   :  { %v65_v11 = vpop.eup %64  ;;  %37 = vst [vmem:[#allocation5] sm:$0xff] %v63_v10 }
  0x30   :  { %38 = vst [vmem:[#allocation5 + $0x8] sm:$0xff] %v65_v11 }
  0x31   :  { %99 = shalt.err (!%p96_p12)
}
  0x32   :  { %s100_s22 = scalar_lea.hbm %s151_s1, 256 }
  0x33   :  { %p101_p13 = scmp.ne.s32.totalorder %s151_s1, %s100_s22  ;;  %p104_p0 = scmp.lt.u32.totalorder %s100_s22, %s151_s1 }
  0x35   :  { %p106_p1 = pnand %p104_p0, %p101_p13 }
  0x37   :  { %109 = shalt.err (!%p106_p1)
}
  0x38   :  { %48 = dma.vmem_to_hbm [thread:$0]  %s46_s19, 256, %s151_s1, [#allocation4]  }
  0x39   :  { %112 = dma.done.wait [#allocation4], 256  }
  0x3a   :  { %113 = vsyncadd [#allocation4], 4294967040 }
  0x3b   :  { %52 = vsyncpa [#allocation3], 1 }
  0x3c   :  { %53 = vsyncpa [#allocation4], 1 }

</bundles_post_ra>
